<compile_context>
chip_gen: v6e
topology: v6e:2x2x1
jax: 0.10.0
libtpu: 0.0.40
codegen_flags: <defaults>
</compile_context>

<pallas_src>
import numpy as np
import jax
import jax.numpy as jnp
from jax.experimental import pallas as pl
from jax.experimental.pallas import tpu as pltpu


# ----------------------------- fused Pallas kernel ------------------------------


def _make_match_loss_kernel(num_aux, num_real_classes):
    """Builds the fused loss kernel (num_aux and true class count are compile-time)."""
    A = int(num_aux)
    C = int(num_real_classes)

    def kernel(nb_ref, main_ref, aux_ref, tgt_ref, mask_ref, logits_ref, tid_ref,
               off_ref, ids_ref, err_ref):
        # nb_ref    : (1,)        SMEM f32   ref_num_boxes (already clamped >= 1)
        # main_ref  : (1, BQ2)    VMEM f32   main-layer centers, flattened lane-dense
        # aux_ref   : (A, BQ2)    VMEM f32   aux-layer centers
        # tgt_ref   : (1, BQ2)    VMEM f32   gt centers aligned to queries
        # mask_ref  : (1, BQ2)    VMEM f32   1.0 where the query is NOT padded
        # logits_ref: (BQ, Cp)    VMEM       id logits, class axis zero-padded to Cp
        # tid_ref   : (BQ, 1)     VMEM i32   target id per query, -1 = invalid/padded
        # off_ref   : (A+1,)      SMEM f32   loss_offset (main + aux layers)
        # ids_ref   : (1,)        SMEM f32   match_loss_ids
        # err_ref   : (1,)        SMEM f32   id_class_error

        # ---------------- id focal loss (heaviest math, lane-dense (BQ, Cp)) --------------
        x = logits_ref[...].astype(jnp.float32)                 # cast in-kernel (bf16-safe)
        tid = tid_ref[...]                                      # (BQ, 1)
        BQ, Cp = x.shape

        valid_row = tid >= 0                                    # (BQ, 1)
        n_valid = jnp.sum(valid_row.astype(jnp.float32))
        flag = (n_valid > 0.0).astype(jnp.float32)
        denom = jnp.maximum(n_valid, 1.0)

        classes = jax.lax.broadcasted_iota(jnp.int32, (BQ, Cp), 1)
        class_valid = classes < C                               # mask out padded classes
        t = (classes == tid).astype(jnp.float32)                # one-hot (tid == -1 -> zeros)
        w = jnp.where(valid_row & class_valid, 1.0, 0.0)        # (BQ, Cp)

        # z-trick: z = (2t-1)*x ; ce = softplus(-z) ; 1-p_t = sigmoid(-z)
        # stable with a single exp + single log over the tile.
        z = (2.0 * t - 1.0) * x
        e = jnp.exp(-jnp.abs(z))                                # in (0, 1]
        log1pe = jnp.log(1.0 + e)
        ce = jnp.maximum(-z, 0.0) + log1pe                      # BCE-with-logits
        one_m_pt = jnp.where(z >= 0.0, e, 1.0) / (1.0 + e)      # 1 - p_t, gamma = 2 below
        alpha_t = 0.75 - 0.5 * t                                # 0.25*t + 0.75*(1-t)
        focal = (alpha_t * w) * ce * one_m_pt * one_m_pt
        ids_ref[0] = jnp.sum(focal) / denom

        # top-1 class error (first-occurrence argmax over the real classes only)
        xm = jnp.where(class_valid, x, -1e30)
        maxv = jnp.max(xm, axis=-1, keepdims=True)
        pred = jnp.min(jnp.where(xm >= maxv, classes, Cp), axis=-1, keepdims=True)
        correct = jnp.sum(jnp.where(valid_row & (pred == tid), 1.0, 0.0))
        err_ref[0] = 100.0 - 100.0 * correct / denom

        # ---------------- masked L1 offsets, main + aux layers ---------------------------
        inv = flag / nb_ref[0]                                  # hoisted scalar scale
        tgt = tgt_ref[...]                                      # (1, BQ2)
        m = mask_ref[...]                                       # (1, BQ2)
        off_ref[0] = jnp.sum(jnp.abs(main_ref[...] - tgt) * m) * inv
        for i in range(A):                                      # static & tiny (aux layers)
            off_ref[1 + i] = jnp.sum(jnp.abs(aux_ref[i] - tgt) * m) * inv

    return kernel


# ----------------------------- wrapper ------------------------------------


def set_criterion_match_forward(ref_coords, aux_ref_coords, ref_id_embeds,
                                padding_mask, tgt_centers, tgt_ids, ref_num_boxes):
    """Pallas implementation of SetCriterion.loss_match (is_next=True, references given)."""
    B, Q, _ = ref_coords.shape
    A = aux_ref_coords.shape[0]
    C = ref_id_embeds.shape[-1]
    BQ = B * Q
    BQ2 = BQ * 2
    Cp = ((C + 127) // 128) * 128 if C > 128 else 128           # lane-dense class axis

    # Lane-dense, contiguous reshapes (no per-layer XLA math, no main/aux concat).
    main_flat = ref_coords.reshape(1, BQ2)
    aux_flat = aux_ref_coords.reshape(A, BQ2)
    tgt_flat = tgt_centers.reshape(1, BQ2)
    mask_flat = jnp.broadcast_to((~padding_mask)[..., None], (B, Q, 2)) \
        .reshape(1, BQ2).astype(jnp.float32)
    logits = ref_id_embeds.reshape(BQ, C)
    if Cp != C:
        logits = jnp.pad(logits, ((0, 0), (0, Cp - C)))
    tid = tgt_ids.reshape(BQ, 1).astype(jnp.int32)
    nb = jnp.array([max(float(ref_num_boxes), 1.0)], dtype=jnp.float32)

    kernel = _make_match_loss_kernel(A, C)
    offsets, loss_ids, class_err = pl.pallas_call(
        kernel,
        out_shape=(
            jax.ShapeDtypeStruct((A + 1,), jnp.float32),
            jax.ShapeDtypeStruct((1,), jnp.float32),
            jax.ShapeDtypeStruct((1,), jnp.float32),
        ),
        in_specs=[
            pl.BlockSpec(memory_space=pltpu.MemorySpace.SMEM),   # nb
            pl.BlockSpec(memory_space=pltpu.MemorySpace.VMEM),   # main coords
            pl.BlockSpec(memory_space=pltpu.MemorySpace.VMEM),   # aux coords
            pl.BlockSpec(memory_space=pltpu.MemorySpace.VMEM),   # tgt centers
            pl.BlockSpec(memory_space=pltpu.MemorySpace.VMEM),   # valid mask
            pl.BlockSpec(memory_space=pltpu.MemorySpace.VMEM),   # id logits (padded)
            pl.BlockSpec(memory_space=pltpu.MemorySpace.VMEM),   # target ids
        ],
        out_specs=(
            pl.BlockSpec(memory_space=pltpu.MemorySpace.SMEM),
            pl.BlockSpec(memory_space=pltpu.MemorySpace.SMEM),
            pl.BlockSpec(memory_space=pltpu.MemorySpace.SMEM),
        ),
    )(nb, main_flat, aux_flat, tgt_flat, mask_flat, logits, tid)

    losses = {'loss_offset': offsets[0]}
    for i in range(A):
        losses[f'aux_loss_offset_{i}'] = offsets[1 + i]
    losses['match_loss_ids'] = loss_ids[0]
    losses['id_class_error'] = class_err[0]
    return losses


# ----------------------------- numpy reference ------------------------------


def _numpy_reference(ref_coords, aux, logits, padding_mask, gt_boxes, gt_ids, num_boxes):
    B = ref_coords.shape[0]
    A = aux.shape[0]
    C = logits.shape[-1]
    num_boxes = max(float(num_boxes), 1.0)
    tgt_centers = np.concatenate([gt_boxes[b][:, :2] for b in range(B)], axis=0)
    tgt_ids_cat = np.concatenate(gt_ids, axis=0)
    flag = 1.0 if (tgt_ids_cat > -1).sum() > 0 else 0.0

    def l1(src):
        s = np.concatenate([src[b][~padding_mask[b]] for b in range(B)], axis=0)
        return np.abs(s - tgt_centers).sum() / num_boxes * flag

    losses = {'loss_offset': l1(ref_coords)}
    for i in range(A):
        losses[f'aux_loss_offset_{i}'] = l1(aux[i])

    valid = np.where(tgt_ids_cat > -1)[0]
    src_logits = np.concatenate([logits[b][~padding_mask[b]] for b in range(B)], axis=0)[valid]
    tids = tgt_ids_cat[valid]
    t = np.zeros((len(valid), C), np.float32)
    t[np.arange(len(valid)), tids] = 1.0
    p = 1.0 / (1.0 + np.exp(-src_logits))
    ce = np.maximum(src_logits, 0.0) - src_logits * t + np.log1p(np.exp(-np.abs(src_logits)))
    p_t = p * t + (1 - p) * (1 - t)
    loss = (0.25 * t + 0.75 * (1 - t)) * ce * (1 - p_t) ** 2
    losses['match_loss_ids'] = loss.sum() / max(1, len(valid))
    pred = src_logits.argmax(-1)
    acc = 100.0 * (pred == tids).sum() / max(1, len(valid))
    losses['id_class_error'] = 100.0 - acc
    return losses


# --------------------------------- main --------------------------------------


if __name__ == "__main__":
    B, Q, C, A = 2, 8, 32, 5   # batch, queries, id classes, aux decoder layers

    key = jax.random.PRNGKey(0)
    k1, k2, k3, k4, k5 = jax.random.split(key, 5)

    ref_coords = jax.random.uniform(k1, (B, Q, 2), dtype=jnp.float32)
    aux_ref_coords = jax.random.uniform(k2, (A, B, Q, 2), dtype=jnp.float32)
    ref_id_embeds = jax.random.normal(k3, (B, Q, C), dtype=jnp.float32)

    # padding: batch 0 keeps 6 queries, batch 1 keeps 5 queries
    padding_mask = np.zeros((B, Q), dtype=bool)
    padding_mask[0, 6:] = True
    padding_mask[1, 5:] = True
    n_per_batch = [int((~padding_mask[b]).sum()) for b in range(B)]

    # references: gt_ref_boxes (n_b, 4) and gt_ref_ids (n_b,) with some -1 (invalid) ids.
    # np.array(...) makes writable host copies (jax arrays are read-only when viewed).
    gt_boxes = [np.array(jax.random.uniform(k4, (n, 4), dtype=jnp.float32)) * (b + 1)
                for b, n in enumerate(n_per_batch)]
    gt_ids = [np.array(jax.random.randint(jax.random.fold_in(k5, b), (n,), -1, C),
                       dtype=np.int32)
              for b, n in enumerate(n_per_batch)]
    gt_ids[0][0] = 3  # ensure at least one valid id -> flag = 1.0

    ref_num_boxes = float(sum(n_per_batch))

    # glue: scatter concatenated targets back onto the query axis (aligned layout)
    tgt_centers = np.zeros((B, Q, 2), np.float32)
    tgt_ids = np.full((B, Q), -1, np.int32)
    for b in range(B):
        qs = np.where(~padding_mask[b])[0]
        tgt_centers[b, qs] = gt_boxes[b][:, :2]
        tgt_ids[b, qs] = gt_ids[b]

    losses = set_criterion_match_forward(
        ref_coords, aux_ref_coords, ref_id_embeds,
        jnp.asarray(padding_mask), jnp.asarray(tgt_centers), jnp.asarray(tgt_ids),
        ref_num_boxes,
    )
    jax.block_until_ready(losses['match_loss_ids'])

    ref = _numpy_reference(np.asarray(ref_coords), np.asarray(aux_ref_coords),
                           np.asarray(ref_id_embeds), padding_mask,
                           gt_boxes, gt_ids, ref_num_boxes)
    for k in ref:
        np.testing.assert_allclose(np.asarray(losses[k]), ref[k], rtol=2e-4, atol=1e-5)

    print("KERNEL_OK")
</pallas_src>

<mosaic_0001>
module attributes {stable_mosaic.version = 11 : i64} {
  func.func @kernel(%arg0: memref<1xf32, #tpu.memory_space<smem>>, %arg1: memref<1x32xf32, #tpu.memory_space<vmem>>, %arg2: memref<5x32xf32, #tpu.memory_space<vmem>>, %arg3: memref<1x32xf32, #tpu.memory_space<vmem>>, %arg4: memref<1x32xf32, #tpu.memory_space<vmem>>, %arg5: memref<16x128xf32, #tpu.memory_space<vmem>>, %arg6: memref<16x1xi32, #tpu.memory_space<vmem>>, %arg7: memref<6xf32, #tpu.memory_space<smem>>, %arg8: memref<1xf32, #tpu.memory_space<smem>>, %arg9: memref<1xf32, #tpu.memory_space<smem>>) attributes {dimension_semantics = [], scalar_prefetch = 0 : i64, scratch_operands = 0 : i64, tpu.core_type = #tpu.core_type<tc>} {
    %c0 = arith.constant 0 : index
    %c0_0 = arith.constant 0 : index
    %0 = vector.load %arg5[%c0, %c0_0] : memref<16x128xf32, #tpu.memory_space<vmem>>, vector<16x128xf32>
    %c0_1 = arith.constant 0 : index
    %c0_2 = arith.constant 0 : index
    %1 = vector.load %arg6[%c0_1, %c0_2] : memref<16x1xi32, #tpu.memory_space<vmem>>, vector<16x1xi32>
    %c0_i32 = arith.constant 0 : i32
    %2 = vector.broadcast %c0_i32 : i32 to vector<16x1xi32>
    %3 = arith.cmpi sge, %1, %2 : vector<16x1xi32>
    %4 = arith.extui %3 : vector<16x1xi1> to vector<16x1xi32>
    %5 = arith.sitofp %4 : vector<16x1xi32> to vector<16x1xf32>
    %6 = vector.shape_cast %5 : vector<16x1xf32> to vector<1x16x1xf32>
    %cst = arith.constant dense<0.000000e+00> : vector<1xf32>
    %7 = vector.multi_reduction <add>, %6, %cst [1, 2] : vector<1x16x1xf32> to vector<1xf32>
    %8 = vector.shape_cast %7 : vector<1xf32> to vector<1x1x1xf32>
    %9 = vector.extract %8[0, 0, 0] : f32 from vector<1x1x1xf32>
    %cst_3 = arith.constant 0.000000e+00 : f32
    %10 = arith.cmpf ogt, %9, %cst_3 : f32
    %11 = arith.extui %10 : i1 to i32
    %12 = arith.sitofp %11 : i32 to f32
    %cst_4 = arith.constant 1.000000e+00 : f32
    %13 = arith.maximumf %9, %cst_4 : f32
    %14 = tpu.iota {dimensions = array<i32: 1>} : vector<16x128xi32>
    %c32_i32 = arith.constant 32 : i32
    %15 = vector.broadcast %c32_i32 : i32 to vector<16x128xi32>
    %16 = arith.cmpi slt, %14, %15 : vector<16x128xi32>
    %17 = vector.broadcast %1 : vector<16x1xi32> to vector<16x128xi32>
    %18 = arith.cmpi eq, %14, %17 : vector<16x128xi32>
    %19 = arith.extui %18 : vector<16x128xi1> to vector<16x128xi32>
    %20 = arith.sitofp %19 : vector<16x128xi32> to vector<16x128xf32>
    %21 = vector.broadcast %3 : vector<16x1xi1> to vector<16x128xi1>
    %22 = arith.andi %21, %16 : vector<16x128xi1>
    %cst_5 = arith.constant 1.000000e+00 : f32
    %cst_6 = arith.constant 0.000000e+00 : f32
    %23 = vector.broadcast %cst_5 : f32 to vector<16x128xf32>
    %24 = vector.broadcast %cst_6 : f32 to vector<16x128xf32>
    %25 = arith.select %22, %23, %24 : vector<16x128xi1>, vector<16x128xf32>
    %cst_7 = arith.constant 2.000000e+00 : f32
    %26 = vector.broadcast %cst_7 : f32 to vector<16x128xf32>
    %27 = arith.mulf %26, %20 : vector<16x128xf32>
    %cst_8 = arith.constant 1.000000e+00 : f32
    %28 = vector.broadcast %cst_8 : f32 to vector<16x128xf32>
    %29 = arith.subf %27, %28 : vector<16x128xf32>
    %30 = arith.mulf %29, %0 : vector<16x128xf32>
    %31 = math.absf %30 : vector<16x128xf32>
    %cst_9 = arith.constant 0.000000e+00 : f32
    %32 = vector.broadcast %cst_9 : f32 to vector<16x128xf32>
    %33 = arith.subf %32, %31 : vector<16x128xf32>
    %34 = math.exp %33 : vector<16x128xf32>
    %cst_10 = arith.constant 1.000000e+00 : f32
    %35 = vector.broadcast %cst_10 : f32 to vector<16x128xf32>
    %36 = arith.addf %35, %34 : vector<16x128xf32>
    %37 = math.log %36 : vector<16x128xf32>
    %cst_11 = arith.constant 0.000000e+00 : f32
    %38 = vector.broadcast %cst_11 : f32 to vector<16x128xf32>
    %39 = arith.subf %38, %30 : vector<16x128xf32>
    %cst_12 = arith.constant 0.000000e+00 : f32
    %40 = vector.broadcast %cst_12 : f32 to vector<16x128xf32>
    %41 = arith.maximumf %39, %40 : vector<16x128xf32>
    %42 = arith.addf %41, %37 : vector<16x128xf32>
    %cst_13 = arith.constant 0.000000e+00 : f32
    %43 = vector.broadcast %cst_13 : f32 to vector<16x128xf32>
    %44 = arith.cmpf oge, %30, %43 : vector<16x128xf32>
    %cst_14 = arith.constant 1.000000e+00 : f32
    %45 = vector.broadcast %cst_14 : f32 to vector<16x128xf32>
    %46 = arith.select %44, %34, %45 : vector<16x128xi1>, vector<16x128xf32>
    %cst_15 = arith.constant 1.000000e+00 : f32
    %47 = vector.broadcast %cst_15 : f32 to vector<16x128xf32>
    %48 = arith.addf %47, %34 : vector<16x128xf32>
    %49 = arith.divf %46, %48 : vector<16x128xf32>
    %cst_16 = arith.constant 5.000000e-01 : f32
    %50 = vector.broadcast %cst_16 : f32 to vector<16x128xf32>
    %51 = arith.mulf %50, %20 : vector<16x128xf32>
    %cst_17 = arith.constant 7.500000e-01 : f32
    %52 = vector.broadcast %cst_17 : f32 to vector<16x128xf32>
    %53 = arith.subf %52, %51 : vector<16x128xf32>
    %54 = arith.mulf %53, %25 : vector<16x128xf32>
    %55 = arith.mulf %54, %42 : vector<16x128xf32>
    %56 = arith.mulf %55, %49 : vector<16x128xf32>
    %57 = arith.mulf %56, %49 : vector<16x128xf32>
    %58 = vector.shape_cast %57 : vector<16x128xf32> to vector<1x16x128xf32>
    %cst_18 = arith.constant dense<0.000000e+00> : vector<1xf32>
    %59 = vector.multi_reduction <add>, %58, %cst_18 [1, 2] : vector<1x16x128xf32> to vector<1xf32>
    %60 = vector.shape_cast %59 : vector<1xf32> to vector<1x1x1xf32>
    %61 = vector.extract %60[0, 0, 0] : f32 from vector<1x1x1xf32>
    %62 = arith.divf %61, %13 : f32
    %c0_19 = arith.constant 0 : index
    %63 = memref.load %arg8[%c0_19] : memref<1xf32, #tpu.memory_space<smem>>
    memref.store %62, %arg8[%c0_19] : memref<1xf32, #tpu.memory_space<smem>>
    %cst_20 = arith.constant -1.000000e+30 : f32
    %64 = vector.broadcast %cst_20 : f32 to vector<16x128xf32>
    %65 = arith.select %16, %0, %64 : vector<16x128xi1>, vector<16x128xf32>
    %cst_21 = arith.constant dense<0xFF800000> : vector<16xf32>
    %66 = vector.multi_reduction <maximumf>, %65, %cst_21 [1] : vector<16x128xf32> to vector<16xf32>
    %67 = vector.shape_cast %66 : vector<16xf32> to vector<16x1xf32>
    %68 = vector.broadcast %67 : vector<16x1xf32> to vector<16x128xf32>
    %69 = arith.cmpf oge, %65, %68 : vector<16x128xf32>
    %c128_i32 = arith.constant 128 : i32
    %70 = vector.broadcast %c128_i32 : i32 to vector<16x128xi32>
    %71 = arith.select %69, %14, %70 : vector<16x128xi1>, vector<16x128xi32>
    %cst_22 = arith.constant dense<2147483647> : vector<16xi32>
    %72 = vector.multi_reduction <minsi>, %71, %cst_22 [1] : vector<16x128xi32> to vector<16xi32>
    %73 = vector.shape_cast %72 : vector<16xi32> to vector<16x1xi32>
    %74 = arith.cmpi eq, %73, %1 : vector<16x1xi32>
    %75 = arith.andi %3, %74 : vector<16x1xi1>
    %cst_23 = arith.constant 1.000000e+00 : f32
    %cst_24 = arith.constant 0.000000e+00 : f32
    %76 = vector.broadcast %cst_23 : f32 to vector<16x1xf32>
    %77 = vector.broadcast %cst_24 : f32 to vector<16x1xf32>
    %78 = arith.select %75, %76, %77 : vector<16x1xi1>, vector<16x1xf32>
    %79 = vector.shape_cast %78 : vector<16x1xf32> to vector<1x16x1xf32>
    %cst_25 = arith.constant dense<0.000000e+00> : vector<1xf32>
    %80 = vector.multi_reduction <add>, %79, %cst_25 [1, 2] : vector<1x16x1xf32> to vector<1xf32>
    %81 = vector.shape_cast %80 : vector<1xf32> to vector<1x1x1xf32>
    %82 = vector.extract %81[0, 0, 0] : f32 from vector<1x1x1xf32>
    %cst_26 = arith.constant 1.000000e+02 : f32
    %83 = arith.mulf %cst_26, %82 : f32
    %84 = arith.divf %83, %13 : f32
    %cst_27 = arith.constant 1.000000e+02 : f32
    %85 = arith.subf %cst_27, %84 : f32
    %c0_28 = arith.constant 0 : index
    %86 = memref.load %arg9[%c0_28] : memref<1xf32, #tpu.memory_space<smem>>
    memref.store %85, %arg9[%c0_28] : memref<1xf32, #tpu.memory_space<smem>>
    %c0_29 = arith.constant 0 : index
    %87 = memref.load %arg0[%c0_29] : memref<1xf32, #tpu.memory_space<smem>>
    %88 = arith.divf %12, %87 : f32
    %c0_30 = arith.constant 0 : index
    %c0_31 = arith.constant 0 : index
    %89 = vector.load %arg3[%c0_30, %c0_31] : memref<1x32xf32, #tpu.memory_space<vmem>>, vector<1x32xf32>
    %c0_32 = arith.constant 0 : index
    %c0_33 = arith.constant 0 : index
    %90 = vector.load %arg4[%c0_32, %c0_33] : memref<1x32xf32, #tpu.memory_space<vmem>>, vector<1x32xf32>
    %c0_34 = arith.constant 0 : index
    %c0_35 = arith.constant 0 : index
    %91 = vector.load %arg1[%c0_34, %c0_35] : memref<1x32xf32, #tpu.memory_space<vmem>>, vector<1x32xf32>
    %92 = arith.subf %91, %89 : vector<1x32xf32>
    %93 = math.absf %92 : vector<1x32xf32>
    %94 = arith.mulf %93, %90 : vector<1x32xf32>
    %95 = vector.shape_cast %94 : vector<1x32xf32> to vector<1x1x32xf32>
    %cst_36 = arith.constant dense<0.000000e+00> : vector<1xf32>
    %96 = vector.multi_reduction <add>, %95, %cst_36 [1, 2] : vector<1x1x32xf32> to vector<1xf32>
    %97 = vector.shape_cast %96 : vector<1xf32> to vector<1x1x1xf32>
    %98 = vector.extract %97[0, 0, 0] : f32 from vector<1x1x1xf32>
    %99 = arith.mulf %98, %88 : f32
    %c0_37 = arith.constant 0 : index
    %100 = memref.load %arg7[%c0_37] : memref<6xf32, #tpu.memory_space<smem>>
    memref.store %99, %arg7[%c0_37] : memref<6xf32, #tpu.memory_space<smem>>
    %c0_38 = arith.constant 0 : index
    %c0_39 = arith.constant 0 : index
    %101 = vector.load %arg2[%c0_38, %c0_39] : memref<5x32xf32, #tpu.memory_space<vmem>>, vector<1x32xf32>
    %102 = vector.shape_cast %101 : vector<1x32xf32> to vector<32xf32>
    %103 = vector.shape_cast %102 : vector<32xf32> to vector<1x32xf32>
    %104 = arith.subf %103, %89 : vector<1x32xf32>
    %105 = math.absf %104 : vector<1x32xf32>
    %106 = arith.mulf %105, %90 : vector<1x32xf32>
    %107 = vector.shape_cast %106 : vector<1x32xf32> to vector<1x1x32xf32>
    %cst_40 = arith.constant dense<0.000000e+00> : vector<1xf32>
    %108 = vector.multi_reduction <add>, %107, %cst_40 [1, 2] : vector<1x1x32xf32> to vector<1xf32>
    %109 = vector.shape_cast %108 : vector<1xf32> to vector<1x1x1xf32>
    %110 = vector.extract %109[0, 0, 0] : f32 from vector<1x1x1xf32>
    %111 = arith.mulf %110, %88 : f32
    %c1 = arith.constant 1 : index
    %112 = memref.load %arg7[%c1] : memref<6xf32, #tpu.memory_space<smem>>
    memref.store %111, %arg7[%c1] : memref<6xf32, #tpu.memory_space<smem>>
    %c1_41 = arith.constant 1 : index
    %c0_42 = arith.constant 0 : index
    %113 = vector.load %arg2[%c1_41, %c0_42] : memref<5x32xf32, #tpu.memory_space<vmem>>, vector<1x32xf32>
    %114 = vector.shape_cast %113 : vector<1x32xf32> to vector<32xf32>
    %115 = vector.shape_cast %114 : vector<32xf32> to vector<1x32xf32>
    %116 = arith.subf %115, %89 : vector<1x32xf32>
    %117 = math.absf %116 : vector<1x32xf32>
    %118 = arith.mulf %117, %90 : vector<1x32xf32>
    %119 = vector.shape_cast %118 : vector<1x32xf32> to vector<1x1x32xf32>
    %cst_43 = arith.constant dense<0.000000e+00> : vector<1xf32>
    %120 = vector.multi_reduction <add>, %119, %cst_43 [1, 2] : vector<1x1x32xf32> to vector<1xf32>
    %121 = vector.shape_cast %120 : vector<1xf32> to vector<1x1x1xf32>
    %122 = vector.extract %121[0, 0, 0] : f32 from vector<1x1x1xf32>
    %123 = arith.mulf %122, %88 : f32
    %c2 = arith.constant 2 : index
    %124 = memref.load %arg7[%c2] : memref<6xf32, #tpu.memory_space<smem>>
    memref.store %123, %arg7[%c2] : memref<6xf32, #tpu.memory_space<smem>>
    %c2_44 = arith.constant 2 : index
    %c0_45 = arith.constant 0 : index
    %125 = vector.load %arg2[%c2_44, %c0_45] : memref<5x32xf32, #tpu.memory_space<vmem>>, vector<1x32xf32>
    %126 = vector.shape_cast %125 : vector<1x32xf32> to vector<32xf32>
    %127 = vector.shape_cast %126 : vector<32xf32> to vector<1x32xf32>
    %128 = arith.subf %127, %89 : vector<1x32xf32>
    %129 = math.absf %128 : vector<1x32xf32>
    %130 = arith.mulf %129, %90 : vector<1x32xf32>
    %131 = vector.shape_cast %130 : vector<1x32xf32> to vector<1x1x32xf32>
    %cst_46 = arith.constant dense<0.000000e+00> : vector<1xf32>
    %132 = vector.multi_reduction <add>, %131, %cst_46 [1, 2] : vector<1x1x32xf32> to vector<1xf32>
    %133 = vector.shape_cast %132 : vector<1xf32> to vector<1x1x1xf32>
    %134 = vector.extract %133[0, 0, 0] : f32 from vector<1x1x1xf32>
    %135 = arith.mulf %134, %88 : f32
    %c3 = arith.constant 3 : index
    %136 = memref.load %arg7[%c3] : memref<6xf32, #tpu.memory_space<smem>>
    memref.store %135, %arg7[%c3] : memref<6xf32, #tpu.memory_space<smem>>
    %c3_47 = arith.constant 3 : index
    %c0_48 = arith.constant 0 : index
    %137 = vector.load %arg2[%c3_47, %c0_48] : memref<5x32xf32, #tpu.memory_space<vmem>>, vector<1x32xf32>
    %138 = vector.shape_cast %137 : vector<1x32xf32> to vector<32xf32>
    %139 = vector.shape_cast %138 : vector<32xf32> to vector<1x32xf32>
    %140 = arith.subf %139, %89 : vector<1x32xf32>
    %141 = math.absf %140 : vector<1x32xf32>
    %142 = arith.mulf %141, %90 : vector<1x32xf32>
    %143 = vector.shape_cast %142 : vector<1x32xf32> to vector<1x1x32xf32>
    %cst_49 = arith.constant dense<0.000000e+00> : vector<1xf32>
    %144 = vector.multi_reduction <add>, %143, %cst_49 [1, 2] : vector<1x1x32xf32> to vector<1xf32>
    %145 = vector.shape_cast %144 : vector<1xf32> to vector<1x1x1xf32>
    %146 = vector.extract %145[0, 0, 0] : f32 from vector<1x1x1xf32>
    %147 = arith.mulf %146, %88 : f32
    %c4 = arith.constant 4 : index
    %148 = memref.load %arg7[%c4] : memref<6xf32, #tpu.memory_space<smem>>
    memref.store %147, %arg7[%c4] : memref<6xf32, #tpu.memory_space<smem>>
    %c4_50 = arith.constant 4 : index
    %c0_51 = arith.constant 0 : index
    %149 = vector.load %arg2[%c4_50, %c0_51] : memref<5x32xf32, #tpu.memory_space<vmem>>, vector<1x32xf32>
    %150 = vector.shape_cast %149 : vector<1x32xf32> to vector<32xf32>
    %151 = vector.shape_cast %150 : vector<32xf32> to vector<1x32xf32>
    %152 = arith.subf %151, %89 : vector<1x32xf32>
    %153 = math.absf %152 : vector<1x32xf32>
    %154 = arith.mulf %153, %90 : vector<1x32xf32>
    %155 = vector.shape_cast %154 : vector<1x32xf32> to vector<1x1x32xf32>
    %cst_52 = arith.constant dense<0.000000e+00> : vector<1xf32>
    %156 = vector.multi_reduction <add>, %155, %cst_52 [1, 2] : vector<1x1x32xf32> to vector<1xf32>
    %157 = vector.shape_cast %156 : vector<1xf32> to vector<1x1x1xf32>
    %158 = vector.extract %157[0, 0, 0] : f32 from vector<1x1x1xf32>
    %159 = arith.mulf %158, %88 : f32
    %c5 = arith.constant 5 : index
    %160 = memref.load %arg7[%c5] : memref<6xf32, #tpu.memory_space<smem>>
    memref.store %159, %arg7[%c5] : memref<6xf32, #tpu.memory_space<smem>>
    return
  }
}

</mosaic_0001>

<bundles_post_ra>
// kernel: tpu_custom_call.1
= control target key start
LH: loop header
LB: loop body
LE: loop exit
PB: predicated region body
PF: predicated region fallthrough
CT: control target
= control target key end

     0   :  { %16 = vsyncpa [#allocation4], 0  ;;  %s639_s0 = inlined_call_operand.<no memory space> [shape: f32[1], index: 0, kind: input, shape index: {}]   ;;  %s640_s1 = inlined_call_operand.vmem [shape: f32[1,32], index: 1, kind: input, shape index: {}]   ;;  %s641_s2 = inlined_call_operand.vmem [shape: f32[5,32], index: 2, kind: input, shape index: {}]   ;;  %s642_s3 = inlined_call_operand.vmem [shape: f32[1,32], index: 3, kind: input, shape index: {}]   ;;  %s643_s4 = inlined_call_operand.hbm [shape: f32[1,32], index: 4, kind: input, shape index: {}]   ;;  %s644_s5 = inlined_call_operand.vmem [shape: f32[16,128], index: 5, kind: input, shape index: {}]   ;;  %s645_s6 = inlined_call_operand.vmem [shape: s32[16,1], index: 6, kind: input, shape index: {}]   ;;  %s646_s7 = inlined_call_operand.hbm [shape: f32[6], index: 7, kind: output, shape index: {0}]   ;;  %s647_s8 = inlined_call_operand.hbm [shape: f32[1], index: 8, kind: output, shape index: {1}]   ;;  %s648_s9 = inlined_call_operand.hbm [shape: f32[1], index: 9, kind: output, shape index: {2}]  }
   0x1   :  { %17 = vsyncpa [#allocation5], 0 }
   0x2   :  { %18 = vsyncpa [#allocation8], 0  ;;  %s474_s30 = smov [#allocation3]  }
   0x3   :  { %s33_s10 = sshll.u32 %s474_s30, 4  ;;  %s34_s10 = int_to_ptr.vmem [resolvable:$true] %s33_s10 }
   0x4   :  { %s432_s11 = scalar_lea.vmem %s34_s10, 16  ;;  %s436_s12 = scalar_lea.vmem %s34_s10, 32 }
   0x5   :  { %p433_p0 = scmp.ne.s32.totalorder %s34_s10, %s432_s11  ;;  %p437_p1 = scmp.lt.s32.totalorder %s34_s10, %s34_s10 }
   0x6   :  { %p438_p2 = scmp.lt.s32.totalorder %s436_s12, %s432_s11 }
   0x8   :  { %p439_p3 = por %p438_p2, %p437_p1 }
   0xa   :  { %p440_p4 = pnand %p439_p3, %p433_p0 }
   0xc   :  { %443 = shalt.err (!%p440_p4)
}
   0xd   :  { %36 = dma.hbm_to_vmem [thread:$0]  %s643_s4, 16, %s34_s10, [#allocation4]  }
   0xe   :  { %468 = dma.done.wait [#allocation4], 16  }
   0xf   :  { %469 = vsyncadd [#allocation4], 4294967280  ;;  %v71_v0 = vlaneseq  ;;  %v44_v2 = vld [vmem:[%s644_s5] sm:$0xff]  ;;  %v45_v3 = vld [vmem:[%s644_s5 + $0x8] sm:$0xff]  ;;  %v475_v6 = vmov 0   ;;  %v476_v27 = vmov 0.0  }
  0x10   :  { %407 = vset.pattern.permute.xlu1 %v475_v6  ;;  %406 = vset.pattern.permute.xlu0 %v475_v6  ;;  %v550_v7 = vld [vmem:[%s645_s6] sm:$0xff]  ;;  %v558_v16 = vld [vmem:[%s645_s6 + $0x8] sm:$0xff]  ;;  %vm54_vm7 = vcmask 7168   ;;  %s477_s11 = smov 1.0   ;;  %s478_s17 = smov [#allocation7]  }
  0x11   :  { %v534_v1 = vand.u32 127, %v71_v0  ;;  %vm48_vm5 = vcmp.ge.s32.totalorder %v550_v7, 0  ;;  %vm49_vm6 = vcmp.ge.s32.totalorder %v558_v16, 0 }
  0x12   :  { %v50_v25 = vsel %vm48_vm5, 1, %v475_v6  ;;  %v51_v26 = vsel %vm49_vm6, 1, %v475_v6  ;;  %v371_v28 = vsel %vm48_vm5, 1.0, %v476_v27  ;;  %v372_v29 = vsel %vm49_vm6, 1.0, %v476_v27 }
  0x13   :  { %vm73_vm0 = vcmp.lt.s32.totalorder %v534_v1, 32  ;;  %v55_v30 = vsel %vm54_vm7, %v371_v28, 0.0  ;;  %v56_v31 = vsel %vm54_vm7, %v372_v29, 0.0 }
  0x14   :  { %v160_v4 = vsel %vm73_vm0, %v44_v2, -1e+30  ;;  %v161_v5 = vsel %vm73_vm0, %v45_v3, -1e+30  ;;  %v57_v32 = vadd.f32 %v56_v31, %v55_v30 }
  0x15   :  { %162 = vmax.xlane.f32.xlu0 %v160_v4 }
  0x19   :  { %164 = vmax.xlane.f32.xlu0 %v161_v5 }
  0x2f   :  { %75 = vperm.xlu0 %406, %v550_v7  }
  0x9e   :  { %v163_v8 = vpop.xlane.xlu0 %162 }
  0x9f   :  { %vm166_vm1 = vcmp.ge.f32.partialorder %v160_v4, %v163_v8 }
  0xa0   :  { %v168_v9 = vsel %vm166_vm1, %v534_v1, 128 }
  0xa1   :  { %v171_v10 = vshra.s32 %v168_v9, 16  ;;  %v170_v17 = vand.u32 65535, %v168_v9 }
  0xa2   :  { %v165_v11 = vpop.xlane.xlu0 %164 }
  0xa3   :  { %vm167_vm2 = vcmp.ge.f32.partialorder %v161_v5, %v165_v11  ;;  %v173_v12 = vcvt.s32.f32 %v171_v10  ;;  %v172_v20 = vcvt.s32.f32 %v170_v17 }
  0xa4   :  { %v169_v13 = vsel %vm167_vm2, %v534_v1, 128 }
  0xa5   :  { %174 = vmin.xlane.f32.xlu1 %v173_v12  ;;  %v185_v14 = vshra.s32 %v169_v13, 16  ;;  %v184_v18 = vand.u32 65535, %v169_v13 }
  0xa7   :  { %v187_v15 = vcvt.s32.f32 %v185_v14  ;;  %v186_v23 = vcvt.s32.f32 %v184_v18  ;;  %v229_v18 = vld [vmem:[%s642_s3] sm:$0x1] }
  0xa9   :  { %188 = vmin.xlane.f32.xlu1 %v187_v15 }
  0xaa   :  { %v76_v33 = vpop.permute.xlu0 %75 }
  0xab   :  { %vm80_vm8 = vcmp.eq.s32.totalorder %v534_v1, %v76_v33 }
  0xac   :  { %v373_v35 = vsel %vm80_vm8, 1.0, %v476_v27 }
  0xad   :  { %v98_v36 = vmul.f32 2.0, %v373_v35  ;;  %v132_v60 = vmul.f32 0.5, %v373_v35 }
  0xaf   :  { %v375_v39 = vadd.f32 -1.0, %v98_v36  ;;  %v134_v9 = vsub.f32 0.75, %v132_v60 }
  0xb1   :  { %v102_v41 = vmul.f32 %v375_v39, %v44_v2 }
  0xb3   :  { %v104_v43 = vand.u32 2147483647, %v102_v41  ;;  %v118_v54 = vsub.f32 0.0, %v102_v41  ;;  %vm124_vm13 = vcmp.ge.f32.partialorder %v102_v41, 0.0  ;;  %v230_v41 = vld [vmem:[#allocation3] sm:$0x1] }
  0xb5   :  { %v106_v45 = vsub.f32 0.0, %v104_v43  ;;  %v120_v2 = vmax.f32 %v118_v54, 0.0 }
  0xb7   :  { %v108_v47 = vmul.f32 1.442695, %v106_v45 }
  0xb9   :  { %408 = vpow2.f32 %v108_v47 }
  0xba   :  { %78 = vperm.xlu1 %407, %v558_v16  }
  0xc6   :  { %v409_v49 = vpop.eup %408 }
  0xc7   :  { %v112_v50 = vadd.f32 1.0, %v409_v49 }
 0x12e   :  { %v175_v19 = vpop.xlane.xlu1 %174 }
 0x12f   :  { %vm176_vm3 = vcmp.eq.f32.partialorder %v173_v12, %v175_v19  ;;  %v181_v53 = vcvt.f32.s32 %v175_v19  ;;  %v231_v19 = vld [vmem:[%s640_s1] sm:$0x1] }
 0x130   :  { %v177_v21 = vsel %vm176_vm3, %v172_v20, inf  ;;  %v232_v28 = vsub.f32 %v231_v19, %v229_v18 }
 0x131   :  { %178 = vmin.xlane.f32.xlu1 %v177_v21  ;;  %v182_v57 = vshll.u32 %v181_v53, 16  ;;  %v126_v21 = vsel %vm124_vm13, %v409_v49, 1.0  ;;  %v300_v53 = vld [vmem:[%s641_s2 + $0x3] sm:$0x1] }
 0x132   :  { %v189_v22 = vpop.xlane.xlu1 %188  ;;  %v233_v39 = vand.u32 2147483647, %v232_v28 }
 0x133   :  { %vm190_vm4 = vcmp.eq.f32.partialorder %v187_v15, %v189_v22  ;;  %v195_v58 = vcvt.f32.s32 %v189_v22 }
 0x134   :  { %v191_v24 = vsel %vm190_vm4, %v186_v23, inf  ;;  %v234_v45 = vmul.f32 %v233_v39, %v230_v41 }
 0x135   :  { %192 = vmin.xlane.f32.xlu0 %v191_v24  ;;  %v196_v5 = vshll.u32 %v195_v58, 16 }
 0x136   :  { %v79_v34 = vpop.permute.xlu1 %78 }
 0x137   :  { %vm81_vm9 = vcmp.eq.s32.totalorder %v534_v1, %v79_v34 }
 0x138   :  { %v374_v37 = vsel %vm81_vm9, 1.0, %v476_v27 }
 0x139   :  { %v99_v38 = vmul.f32 2.0, %v374_v37  ;;  %v133_v8 = vmul.f32 0.5, %v374_v37 }
 0x13b   :  { %v376_v40 = vadd.f32 -1.0, %v99_v38  ;;  %v135_v22 = vsub.f32 0.75, %v133_v8 }
 0x13d   :  { %v103_v42 = vmul.f32 %v376_v40, %v45_v3 }
 0x13f   :  { %v105_v44 = vand.u32 2147483647, %v103_v42  ;;  %v119_v61 = vsub.f32 0.0, %v103_v42  ;;  %vm125_vm14 = vcmp.ge.f32.partialorder %v103_v42, 0.0  ;;  %v266_v42 = vld [vmem:[%s641_s2 + $0x1] sm:$0x1] }
 0x141   :  { %v107_v46 = vsub.f32 0.0, %v105_v44  ;;  %v121_v12 = vmax.f32 %v119_v61, 0.0  ;;  %v317_v61 = vld [vmem:[%s641_s2 + $0x4] sm:$0x1] }
 0x142   :  { %87 = vperm.xlu1 %407, %v50_v25  }
 0x143   :  { %v110_v48 = vmul.f32 1.442695, %v107_v46  ;;  %v267_v46 = vsub.f32 %v266_v42, %v229_v18 }
 0x145   :  { %410 = vpow2.f32 %v110_v48  ;;  %v283_v48 = vld [vmem:[%s641_s2 + $0x2] sm:$0x1] }
 0x146   :  { %90 = vperm.xlu1 %407, %v51_v26   ;;  %412 = vlog2.f32 %v112_v50 }
 0x152   :  { %v411_v51 = vpop.eup %410 }
 0x153   :  { %v113_v52 = vadd.f32 1.0, %v411_v51  ;;  %v413_v56 = vpop.eup %412  ;;  %v127_v26 = vsel %vm125_vm14, %v411_v51, 1.0  ;;  %v268_v51 = vand.u32 2147483647, %v267_v46 }
 0x154   :  { %v115_v0 = vmul.f32 0.6931472, %v413_v56 }
 0x155   :  { %414 = vlog2.f32 %v113_v52 }
 0x156   :  { %416 = vrcp.f32 %v112_v50  ;;  %v122_v13 = vadd.f32 %v120_v2, %v115_v0  ;;  %v318_v0 = vsub.f32 %v317_v61, %v229_v18 }
 0x157   :  { %418 = vrcp.f32 %v113_v52  ;;  %v284_v52 = vsub.f32 %v283_v48, %v229_v18 }
 0x159   :  { %v285_v56 = vand.u32 2147483647, %v284_v52 }
 0x162   :  { %v415_v4 = vpop.eup %414 }
 0x163   :  { %v117_v15 = vmul.f32 0.6931472, %v415_v4  ;;  %v417_v20 = vpop.eup %416 }
 0x164   :  { %v419_v24 = vpop.eup %418  ;;  %v129_v31 = vmul.f32 %v417_v20, %v126_v21 }
 0x165   :  { %v123_v29 = vadd.f32 %v121_v12, %v117_v15  ;;  %v131_v36 = vmul.f32 %v419_v24, %v127_v26 }
 0x16a   :  { %58 = vadd.xlane.f32.xlu1 %v57_v32  ;;  %v249_v32 = vld [vmem:[%s641_s2] sm:$0x1] }
 0x1ba   :  { %v179_v55 = vpop.xlane.xlu1 %178 }
 0x1bb   :  { %v180_v59 = vcvt.f32.s32 %v179_v55  ;;  %v269_v55 = vmul.f32 %v268_v51, %v230_v41 }
 0x1bd   :  { %v183_v62 = vadd.s32 %v182_v57, %v180_v59  ;;  %v301_v57 = vsub.f32 %v300_v53, %v229_v18  ;;  %v286_v59 = vmul.f32 %v285_v56, %v230_v41 }
 0x1be   :  { %v88_v63 = vpop.permute.xlu1 %87  ;;  %v193_v3 = vpop.xlane.xlu0 %192 }
 0x1bf   :  { %vm198_vm10 = vcmp.eq.s32.totalorder %v183_v62, %v550_v7  ;;  %vm92_vm11 = vcmp.eq.s32.totalorder %v88_v63, 1  ;;  %v194_v6 = vcvt.f32.s32 %v193_v3  ;;  %v302_v60 = vand.u32 2147483647, %v301_v57 }
 0x1c0   :  { %vm94_vm12 = vmand %vm92_vm11, %vm73_vm0  ;;  %v319_v3 = vand.u32 2147483647, %v318_v0 }
 0x1c1   :  { %v96_v10 = vsel %vm94_vm12, 1.0, %v476_v27  ;;  %v197_v11 = vadd.s32 %v196_v5, %v194_v6  ;;  %vm200_vm15 = vmand %vm48_vm5, %vm198_vm10  ;;  %v303_v63 = vmul.f32 %v302_v60, %v230_v41 }
 0x1c2   :  { %v136_v14 = vmul.f32 %v134_v9, %v96_v10  ;;  %v91_v17 = vpop.permute.xlu1 %90  ;;  %v202_v23 = vsel %vm200_vm15, 1.0, %v476_v27  ;;  %v320_v4 = vmul.f32 %v319_v3, %v230_v41 }
 0x1c3   :  { %vm199_vm1 = vcmp.eq.s32.totalorder %v197_v11, %v558_v16  ;;  %vm93_vm2 = vcmp.eq.s32.totalorder %v91_v17, 1  ;;  %v204_v33 = vsel %vm54_vm7, %v202_v23, 0.0  ;;  %v250_v16 = vsub.f32 %v249_v32, %v229_v18 }
 0x1c4   :  { %v138_v7 = vmul.f32 %v136_v14, %v122_v13  ;;  %vm95_vm3 = vmand %vm93_vm2, %vm73_vm0  ;;  %vm235_vm0 = vcmask 253952  }
 0x1c5   :  { %v97_v25 = vsel %vm95_vm3, 1.0, %v476_v27  ;;  %vm201_vm4 = vmand %vm49_vm6, %vm199_vm1  ;;  %v236_v49 = vsel %vm235_vm0, %v234_v45, 0.0  ;;  %v270_v58 = vsel %vm235_vm0, %v269_v55, 0.0  ;;  %v287_v62 = vsel %vm235_vm0, %v286_v59, 0.0 }
 0x1c6   :  { %v137_v30 = vmul.f32 %v135_v22, %v97_v25  ;;  %v203_v1 = vsel %vm201_vm4, 1.0, %v476_v27  ;;  %v140_v37 = vmul.f32 %v138_v7, %v129_v31  ;;  %v251_v27 = vand.u32 2147483647, %v250_v16 }
 0x1c7   :  { %v205_v34 = vsel %vm54_vm7, %v203_v1, 0.0  ;;  %v304_v2 = vsel %vm235_vm0, %v303_v63, 0.0  ;;  %v321_v5 = vsel %vm235_vm0, %v320_v4, 0.0 }
 0x1c8   :  { %v139_v35 = vmul.f32 %v137_v30, %v123_v29  ;;  %v206_v38 = vadd.f32 %v205_v34, %v204_v33  ;;  %v142_v43 = vmul.f32 %v140_v37, %v129_v31  ;;  %v252_v50 = vmul.f32 %v251_v27, %v230_v41 }
 0x1c9   :  { %v225_v31 = vstv %s639_s0 }
 0x1ca   :  { %v141_v40 = vmul.f32 %v139_v35, %v131_v36  ;;  %v253_v54 = vsel %vm235_vm0, %v252_v50, 0.0 }
 0x1cc   :  { %v143_v44 = vmul.f32 %v141_v40, %v131_v36 }
 0x1ce   :  { %v144_v47 = vadd.f32 %v143_v44, %v142_v43 }
 0x1d0   :  { %145 = vadd.xlane.f32.xlu0 %v144_v47 }
 0x1d4   :  { %237 = vadd.xlane.f32.xlu0 %v236_v49 }
 0x1d8   :  { %254 = vadd.xlane.f32.xlu0 %v253_v54 }
 0x1dc   :  { %271 = vadd.xlane.f32.xlu0 %v270_v58 }
 0x1e0   :  { %288 = vadd.xlane.f32.xlu0 %v287_v62 }
 0x1e4   :  { %305 = vadd.xlane.f32.xlu0 %v304_v2 }
 0x1e8   :  { %207 = vadd.xlane.f32.xlu0 %v206_v38 }
 0x1ec   :  { %322 = vadd.xlane.f32.xlu0 %v321_v5 }
 0x1f3   :  { %v59_v6 = vpop.xlane.xlu1 %58 }
 0x1f4   :  { %v60_v8 = vrot.slane %v59_v6, 4 }
 0x1f6   :  { %v61_v9 = vadd.f32 %v60_v8, %v59_v6 }
 0x1f8   :  { %v62_v10 = vrot.slane %v61_v9, 2 }
 0x1fa   :  { %v63_v11 = vadd.f32 %v62_v10, %v61_v9 }
 0x1fc   :  { %v64_v12 = vrot.slane %v63_v11, 1 }
 0x1fe   :  { %v65_v13 = vadd.f32 %v64_v12, %v63_v11 }
 0x200   :  { %377 = vpush %v65_v13 }
 0x231   :  { %s623_s2 = spop %377 }
 0x232   :  { %s70_s12 = smax.f32 %s477_s11, %s623_s2  ;;  %p67_p5 = scmp.gt.f32.partialorder %s623_s2, 0.0 }
 0x233   :  { %v154_v14 = vstv %s70_s12  ;;  %s479_s12 = smov [#allocation9]  }
 0x234   :  { %420 = vrcp.f32 %v154_v14  ;;  %s68_s19 = scalar_select %p67_p5, 1, 0 }
 0x235   :  { %422 = vrcp.f32 %v225_v31 }
 0x236   :  { %s69_s5 = scvt.s32.f32 %s68_s19 }
 0x241   :  { %v421_v23 = vpop.eup %420 }
 0x242   :  { %v423_v59 = vpop.eup %422 }
 0x259   :  { %v146_v15 = vpop.xlane.xlu0 %145 }
 0x25a   :  { %v147_v17 = vrot.slane %v146_v15, 4 }
 0x25c   :  { %v148_v18 = vadd.f32 %v147_v17, %v146_v15 }
 0x25d   :  { %v238_v19 = vpop.xlane.xlu0 %237 }
 0x25e   :  { %v149_v20 = vrot.slane %v148_v18, 2  ;;  %v239_v28 = vrot.slane %v238_v19, 4 }
 0x260   :  { %v150_v21 = vadd.f32 %v149_v20, %v148_v18  ;;  %v240_v33 = vadd.f32 %v239_v28, %v238_v19 }
 0x261   :  { %v255_v22 = vpop.xlane.xlu0 %254 }
 0x262   :  { %v151_v7 = vrot.slane %v150_v21, 1  ;;  %v256_v29 = vrot.slane %v255_v22, 4  ;;  %v241_v39 = vrot.slane %v240_v33, 2 }
 0x264   :  { %v152_v24 = vadd.f32 %v151_v7, %v150_v21  ;;  %v257_v35 = vadd.f32 %v256_v29, %v255_v22  ;;  %v242_v48 = vadd.f32 %v241_v39, %v240_v33 }
 0x265   :  { %v272_v25 = vpop.xlane.xlu0 %271 }
 0x266   :  { %379 = vpush %v152_v24  ;;  %v273_v30 = vrot.slane %v272_v25, 4  ;;  %v258_v41 = vrot.slane %v257_v35, 2  ;;  %v243_v56 = vrot.slane %v242_v48, 1 }
 0x267   :  { %381 = vpush %v421_v23 }
 0x268   :  { %v274_v36 = vadd.f32 %v273_v30, %v272_v25  ;;  %v259_v49 = vadd.f32 %v258_v41, %v257_v35  ;;  %v244_v0 = vadd.f32 %v243_v56, %v242_v48 }
 0x269   :  { %v289_v26 = vpop.xlane.xlu0 %288 }
 0x26a   :  { %v290_v32 = vrot.slane %v289_v26, 4  ;;  %v275_v42 = vrot.slane %v274_v36, 2  ;;  %v260_v58 = vrot.slane %v259_v49, 1 }
 0x26c   :  { %v291_v37 = vadd.f32 %v290_v32, %v289_v26  ;;  %v276_v52 = vadd.f32 %v275_v42, %v274_v36  ;;  %v261_v4 = vadd.f32 %v260_v58, %v259_v49 }
 0x26d   :  { %v306_v1 = vpop.xlane.xlu0 %305 }
 0x26e   :  { %v307_v34 = vrot.slane %v306_v1, 4  ;;  %v292_v44 = vrot.slane %v291_v37, 2  ;;  %v277_v62 = vrot.slane %v276_v52, 1 }
 0x270   :  { %v308_v16 = vadd.f32 %v307_v34, %v306_v1  ;;  %v293_v53 = vadd.f32 %v292_v44, %v291_v37  ;;  %v278_v5 = vadd.f32 %v277_v62, %v276_v52 }
 0x271   :  { %v208_v38 = vpop.xlane.xlu0 %207 }
 0x272   :  { %v209_v40 = vrot.slane %v208_v38, 4  ;;  %v309_v27 = vrot.slane %v308_v16, 2  ;;  %v294_v63 = vrot.slane %v293_v53, 1 }
 0x274   :  { %v210_v43 = vadd.f32 %v209_v40, %v208_v38  ;;  %v310_v57 = vadd.f32 %v309_v27, %v308_v16  ;;  %v295_v6 = vadd.f32 %v294_v63, %v293_v53 }
 0x275   :  { %v323_v45 = vpop.xlane.xlu0 %322 }
 0x276   :  { %v211_v46 = vrot.slane %v210_v43, 2  ;;  %v324_v47 = vrot.slane %v323_v45, 4  ;;  %v311_v2 = vrot.slane %v310_v57, 1 }
 0x278   :  { %v325_v50 = vadd.f32 %v324_v47, %v323_v45  ;;  %v212_v51 = vadd.f32 %v211_v46, %v210_v43  ;;  %v312_v9 = vadd.f32 %v311_v2, %v310_v57 }
 0x27a   :  { %v326_v54 = vrot.slane %v325_v50, 2  ;;  %v213_v55 = vrot.slane %v212_v51, 1 }
 0x27c   :  { %v327_v60 = vadd.f32 %v326_v54, %v325_v50  ;;  %v214_v61 = vadd.f32 %v213_v55, %v212_v51 }
 0x27e   :  { %383 = vpush %v214_v61  ;;  %v328_v3 = vrot.slane %v327_v60, 1 }
 0x27f   :  { %385 = vpush %v423_v59 }
 0x280   :  { %387 = vpush %v244_v0  ;;  %v329_v8 = vadd.f32 %v328_v3, %v327_v60 }
 0x281   :  { %389 = vpush %v261_v4 }
 0x282   :  { %391 = vpush %v278_v5 }
 0x283   :  { %393 = vpush %v295_v6 }
 0x284   :  { %395 = vpush %v312_v9 }
 0x285   :  { %397 = vpush %v329_v8 }
 0x297   :  { %s380_s0 = spop %379 }
 0x298   :  { %s382_s15 = spop %381 }
 0x299   :  { %s157_s16 = smul.f32 %s382_s15, %s380_s0  ;;  %s480_s0 = smov [#allocation6]  }
 0x29b   :  { %159 = sst [smem:[#allocation7]] %s157_s16 }
 0x29c   :  { %349 = dma.smem_to_hbm %s478_s17, 16, %s647_s8, [#allocation8]  }
 0x2af   :  { %s384_s20 = spop %383 }
 0x2b0   :  { %s216_s6 = smul.f32 100.0, %s384_s20  ;;  %s386_s21 = spop %385 }
 0x2b1   :  { %s228_s22 = smul.f32 %s386_s21, %s69_s5  ;;  %s388_s23 = spop %387 }
 0x2b2   :  { %s220_s1 = smul.f32 %s382_s15, %s216_s6  ;;  %s390_s3 = spop %389 }
 0x2b3   :  { %s246_s24 = smul.f32 %s388_s23, %s228_s22  ;;  %s392_s25 = spop %391 }
 0x2b4   :  { %s221_s26 = ssub.f32 100.0, %s220_s1  ;;  %s263_s27 = smul.f32 %s390_s3, %s228_s22 }
 0x2b5   :  { %248 = sst [smem:[#allocation6]] %s246_s24  ;;  %s280_s28 = smul.f32 %s392_s25, %s228_s22 }
 0x2b6   :  { %265 = sst [smem:[#allocation6 + $0x1]] %s263_s27  ;;  %s394_s29 = spop %393 }
 0x2b7   :  { %282 = sst [smem:[#allocation6 + $0x2]] %s280_s28  ;;  %s297_s8 = smul.f32 %s394_s29, %s228_s22 }
 0x2b8   :  { %s396_s30 = spop %395  ;;  %223 = sst [smem:[#allocation9]] %s221_s26 }
 0x2b9   :  { %299 = sst [smem:[#allocation6 + $0x3]] %s297_s8  ;;  %s314_s10 = smul.f32 %s396_s30, %s228_s22 }
 0x2ba   :  { %s398_s2 = spop %397 }
 0x2bb   :  { %316 = sst [smem:[#allocation6 + $0x4]] %s314_s10  ;;  %s331_s11 = smul.f32 %s398_s2, %s228_s22 }
 0x2bc   :  { %357 = dma.smem_to_hbm %s479_s12, 16, %s648_s9, [#allocation8]  }
 0x2bd   :  { %333 = sst [smem:[#allocation6 + $0x5]] %s331_s11 }
 0x2be   :  { %341 = dma.smem_to_hbm %s480_s0, 16, %s646_s7, [#allocation5]  }
 0x2bf   :  { %470 = dma.done.wait [#allocation5], 16  }
 0x2c0   :  { %471 = vsyncadd [#allocation5], 4294967280 }
 0x2c1   :  { %472 = dma.done.wait [#allocation8], 32  }
 0x2c2   :  { %473 = vsyncadd [#allocation8], 4294967264 }
 0x2c3   :  { %367 = sfence }
 0x2c4   :  { %368 = vsyncpa [#allocation4], 1 }
 0x2c5   :  { %369 = vsyncpa [#allocation5], 1 }
 0x2c6   :  { %370 = vsyncpa [#allocation8], 1 }

</bundles_post_ra>
